<compile_context>
chip_gen: v5e
topology: v5e:2x2
jax: 0.10.0
libtpu: 0.0.40
codegen_flags: <defaults>
</compile_context>

<pallas_src>
import functools

import jax
import jax.numpy as jnp
from jax.experimental import pallas as pl
from jax.experimental.pallas import tpu as pltpu


def _concat_kernel(offsets, x1_ref, x2_ref, x3_ref, x4_ref, x5_ref, o_ref):
    # Input tiles: (TILE_N, F_i); output tile: (TILE_N, F_total).
    # Offsets are Python ints -> purely static column-window stores.
    for ref, off in zip((x1_ref, x2_ref, x3_ref, x4_ref, x5_ref), offsets):
        f = ref.shape[-1]
        o_ref[:, off:off + f] = ref[...]


def _pick_tile_n(n):
    """Largest sublane-aligned batch tile that divides N (capped for VMEM),
    falling back to a single full-array block when N is small / unaligned."""
    if n <= 8 or n % 8 != 0:
        return n
    for t in (1024, 512, 256, 128, 64, 32, 16, 8):
        if t <= n and n % t == 0:
            return t
    return n


@functools.partial(jax.jit, static_argnames=("adjust_dim", "concat"))
def shape_module_forward(x1, x2, x3, x4, x5, adjust_dim=True, concat=True):
    xs = (x1, x2, x3, x4, x5)
    if not concat:
        # No compute: pure metadata reshape, no kernel needed.
        if adjust_dim:
            return tuple(x[:, None, ...] for x in xs)
        return xs

    n = xs[0].shape[0]
    # unsqueeze(1) followed by view(N, -1) is just a per-sample flatten.
    flats = [x.reshape(n, -1) for x in xs]
    widths = [f.shape[1] for f in flats]
    offsets = []
    acc = 0
    for w in widths:
        offsets.append(acc)
        acc += w
    f_total = acc
    dtype = flats[0].dtype

    tile_n = _pick_tile_n(n)
    grid = (n // tile_n,)

    in_specs = [pl.BlockSpec((tile_n, w), lambda i: (i, 0)) for w in widths]
    out_spec = pl.BlockSpec((tile_n, f_total), lambda i: (i, 0))

    itemsize = jnp.dtype(dtype).itemsize
    cost = pl.CostEstimate(
        flops=0,
        transcendentals=0,
        bytes_accessed=2 * n * f_total * itemsize,  # read everything + write once
    )

    out_flat = pl.pallas_call(
        functools.partial(_concat_kernel, tuple(offsets)),
        out_shape=jax.ShapeDtypeStruct((n, f_total), dtype),
        grid=grid,
        in_specs=in_specs,
        out_specs=out_spec,
        compiler_params=pltpu.CompilerParams(
            dimension_semantics=("parallel",)),
        cost_estimate=cost,
    )(*flats)

    return out_flat.reshape(n, 1, f_total)


def shape_module_reference(x1, x2, x3, x4, x5):
    """Pure-JAX reference mirroring the PyTorch forward (default flags)."""
    n = x1.shape[0]
    flats = [x.reshape(n, -1) for x in (x1, x2, x3, x4, x5)]
    return jnp.concatenate(flats, axis=1).reshape(n, 1, -1)


if __name__ == "__main__":
    key = jax.random.PRNGKey(0)
    ks = jax.random.split(key, 5)
    n = 2
    # Small, deterministic inputs with mixed ranks (the module flattens each).
    # Feature widths 16 + 32 + 48 + 64 + 96 = 256, so the fused output slab
    # is lane-dense (multiple of 128) for an unmasked HBM writeback.
    x1 = jax.random.normal(ks[0], (n, 16), jnp.float32)
    x2 = jax.random.normal(ks[1], (n, 32), jnp.float32)
    x3 = jax.random.normal(ks[2], (n, 4, 12), jnp.float32)
    x4 = jax.random.normal(ks[3], (n, 64), jnp.float32)
    x5 = jax.random.normal(ks[4], (n, 96), jnp.float32)

    out = jax.block_until_ready(shape_module_forward(x1, x2, x3, x4, x5))
    ref = jax.block_until_ready(shape_module_reference(x1, x2, x3, x4, x5))

    assert out.shape == (n, 1, 256), out.shape
    assert out.dtype == ref.dtype
    assert jnp.array_equal(out, ref), float(jnp.max(jnp.abs(out - ref)))

    # concat=False branch (no kernel, pure reshape) -- quick sanity check.
    parts = shape_module_forward(x1, x2, x3, x4, x5, adjust_dim=True, concat=False)
    assert parts[0].shape == (n, 1, 16) and parts[2].shape == (n, 1, 4, 12)

    print("KERNEL_OK")
</pallas_src>

<mosaic_0001>
module attributes {stable_mosaic.version = 11 : i64} {
  func.func @_concat_kernel(%arg0: i32, %arg1: memref<2x16xf32, #tpu.memory_space<vmem>>, %arg2: memref<2x32xf32, #tpu.memory_space<vmem>>, %arg3: memref<2x48xf32, #tpu.memory_space<vmem>>, %arg4: memref<2x64xf32, #tpu.memory_space<vmem>>, %arg5: memref<2x96xf32, #tpu.memory_space<vmem>>, %arg6: memref<2x256xf32, #tpu.memory_space<vmem>>) attributes {dimension_semantics = [#tpu.dimension_semantics<parallel>], iteration_bounds = array<i64: 1>, scalar_prefetch = 0 : i64, scratch_operands = 0 : i64, tpu.core_type = #tpu.core_type<tc>, window_params = [{transform_indices = @transform_0, window_bounds = array<i64: 2, 16>}, {transform_indices = @transform_1, window_bounds = array<i64: 2, 32>}, {transform_indices = @transform_2, window_bounds = array<i64: 2, 48>}, {transform_indices = @transform_3, window_bounds = array<i64: 2, 64>}, {transform_indices = @transform_4, window_bounds = array<i64: 2, 96>}, {transform_indices = @transform_5, window_bounds = array<i64: 2, 256>}]} {
    %c0 = arith.constant 0 : index
    %c0_0 = arith.constant 0 : index
    %0 = vector.load %arg1[%c0, %c0_0] : memref<2x16xf32, #tpu.memory_space<vmem>>, vector<2x16xf32>
    %c0_1 = arith.constant 0 : index
    %c0_2 = arith.constant 0 : index
    %1 = vector.load %arg6[%c0_1, %c0_2] : memref<2x256xf32, #tpu.memory_space<vmem>>, vector<2x16xf32>
    tpu.vector_store %arg6[%c0_1, %c0_2], %0 {strides = array<i32>} : memref<2x256xf32, #tpu.memory_space<vmem>>, vector<2x16xf32>,
    %c0_3 = arith.constant 0 : index
    %c0_4 = arith.constant 0 : index
    %2 = vector.load %arg2[%c0_3, %c0_4] : memref<2x32xf32, #tpu.memory_space<vmem>>, vector<2x32xf32>
    %c0_5 = arith.constant 0 : index
    %c16 = arith.constant 16 : index
    %3 = vector.load %arg6[%c0_5, %c16] : memref<2x256xf32, #tpu.memory_space<vmem>>, vector<2x32xf32>
    tpu.vector_store %arg6[%c0_5, %c16], %2 {strides = array<i32>} : memref<2x256xf32, #tpu.memory_space<vmem>>, vector<2x32xf32>,
    %c0_6 = arith.constant 0 : index
    %c0_7 = arith.constant 0 : index
    %4 = vector.load %arg3[%c0_6, %c0_7] : memref<2x48xf32, #tpu.memory_space<vmem>>, vector<2x48xf32>
    %c0_8 = arith.constant 0 : index
    %c48 = arith.constant 48 : index
    %5 = vector.load %arg6[%c0_8, %c48] : memref<2x256xf32, #tpu.memory_space<vmem>>, vector<2x48xf32>
    tpu.vector_store %arg6[%c0_8, %c48], %4 {strides = array<i32>} : memref<2x256xf32, #tpu.memory_space<vmem>>, vector<2x48xf32>,
    %c0_9 = arith.constant 0 : index
    %c0_10 = arith.constant 0 : index
    %6 = vector.load %arg4[%c0_9, %c0_10] : memref<2x64xf32, #tpu.memory_space<vmem>>, vector<2x64xf32>
    %c0_11 = arith.constant 0 : index
    %c96 = arith.constant 96 : index
    %7 = vector.load %arg6[%c0_11, %c96] : memref<2x256xf32, #tpu.memory_space<vmem>>, vector<2x64xf32>
    tpu.vector_store %arg6[%c0_11, %c96], %6 {strides = array<i32>} : memref<2x256xf32, #tpu.memory_space<vmem>>, vector<2x64xf32>,
    %c0_12 = arith.constant 0 : index
    %c0_13 = arith.constant 0 : index
    %8 = vector.load %arg5[%c0_12, %c0_13] : memref<2x96xf32, #tpu.memory_space<vmem>>, vector<2x96xf32>
    %c0_14 = arith.constant 0 : index
    %c160 = arith.constant 160 : index
    %9 = vector.load %arg6[%c0_14, %c160] : memref<2x256xf32, #tpu.memory_space<vmem>>, vector<2x96xf32>
    tpu.vector_store %arg6[%c0_14, %c160], %8 {strides = array<i32>} : memref<2x256xf32, #tpu.memory_space<vmem>>, vector<2x96xf32>,
    return
  }
  func.func @transform_0(%arg0: i32) -> (i32, i32) {
    %c0_i32 = arith.constant 0 : i32
    %c0_i32_0 = arith.constant 0 : i32
    return %arg0, %c0_i32 : i32, i32
  }
  func.func @transform_1(%arg0: i32) -> (i32, i32) {
    %c0_i32 = arith.constant 0 : i32
    %c0_i32_0 = arith.constant 0 : i32
    return %arg0, %c0_i32 : i32, i32
  }
  func.func @transform_2(%arg0: i32) -> (i32, i32) {
    %c0_i32 = arith.constant 0 : i32
    %c0_i32_0 = arith.constant 0 : i32
    return %arg0, %c0_i32 : i32, i32
  }
  func.func @transform_3(%arg0: i32) -> (i32, i32) {
    %c0_i32 = arith.constant 0 : i32
    %c0_i32_0 = arith.constant 0 : i32
    return %arg0, %c0_i32 : i32, i32
  }
  func.func @transform_4(%arg0: i32) -> (i32, i32) {
    %c0_i32 = arith.constant 0 : i32
    %c0_i32_0 = arith.constant 0 : i32
    return %arg0, %c0_i32 : i32, i32
  }
  func.func @transform_5(%arg0: i32) -> (i32, i32) {
    %c0_i32 = arith.constant 0 : i32
    %c0_i32_0 = arith.constant 0 : i32
    return %arg0, %c0_i32 : i32, i32
  }
}

</mosaic_0001>

<bundles_post_ra>
// kernel: shape_module_forward.1
= control target key start
LH: loop header
LB: loop body
LE: loop exit
PB: predicated region body
PF: predicated region fallthrough
CT: control target
= control target key end

     0   :  { %s64_s22 = smov 96   ;;  %s65_s23 = smov 48   ;;  %vm21_vm0 = vcmask 123904   ;;  %vm45_vm1 = vcmask 1042176   ;;  %vm46_vm2 = vcmask 257026   ;;  %vm28_vm3 = vcmask 386176   ;;  %s128_s3 = inlined_call_operand.vmem [shape: f32[2,64], index: 3, kind: input, shape index: {}]   ;;  %s129_s2 = inlined_call_operand.vmem [shape: f32[2,48], index: 2, kind: input, shape index: {}]   ;;  %s130_s1 = inlined_call_operand.vmem [shape: f32[2,32], index: 1, kind: input, shape index: {}]   ;;  %s131_s4 = inlined_call_operand.vmem [shape: f32[2,96], index: 4, kind: input, shape index: {}]   ;;  %s132_s0 = inlined_call_operand.vmem [shape: f32[2,16], index: 0, kind: input, shape index: {}]   ;;  %s133_s5 = inlined_call_operand.vmem [shape: f32[2,256], index: 5, kind: output, shape index: {}]  }
   0x1   :  { %v37_v0 = vld [vmem:[%s128_s3] sm:$0x3]  ;;  %s66_s28 = smov 16   ;;  %s67_s29 = smov 32   ;;  %vm42_vm4 = vcmask 785408   ;;  %vm35_vm5 = vcmask 779648   ;;  %vm47_vm6 = vmor %vm46_vm2, %vm45_vm1 }
   0x2   :  { %v30_v1 = vld [vmem:[%s129_s2] sm:$0x3]  ;;  %39 = vrot.lane.b32.xlu0 %v37_v0, %s64_s22  ;;  %vm54_vm7 = vcmask 1041664  }
   0x3   :  { %32 = vrot.lane.b32.xlu1 %v30_v1, %s65_s23  ;;  %v23_v2 = vld [vmem:[%s130_s1] sm:$0x3] }
   0x4   :  { %v49_v3 = vld [vmem:[%s131_s4] sm:$0x3] }
   0x5   :  { %v20_v4 = vld [vmem:[%s132_s0] sm:$0x3] }
   0x6   :  { %22 = vst.msk [vmem:[%s133_s5] sm:$0x3] %vm21_vm0, %v20_v4 }
   0xa   :  { %25 = vrot.lane.b32.xlu0 %v23_v2, %s66_s28 }
   0xb   :  { %51 = vrot.lane.b32.xlu1 %v49_v3, %s67_s29 }
  0x74   :  { %v40_v5 = vpop.permute.xlu0 %39 }
  0x75   :  { %v33_v6 = vpop.permute.xlu1 %32  ;;  %v41_v7 = vrot.slane %v40_v5, 6 }
  0x77   :  { %v43_v10 = vsel %vm42_vm4, %v41_v7, %v40_v5 }
  0x7c   :  { %v26_v8 = vpop.permute.xlu0 %25 }
  0x7d   :  { %29 = vst.msk [vmem:[%s133_s5] sm:$0x3] %vm28_vm3, %v26_v8  ;;  %v52_v9 = vpop.permute.xlu1 %51 }
  0x7e   :  { %36 = vst.msk [vmem:[%s133_s5] sm:$0x3] %vm35_vm5, %v33_v6 }
  0x7f   :  { %48 = vst.msk [vmem:[%s133_s5] sm:$0xf] %vm47_vm6, %v43_v10 }
  0x80   :  { %55 = vst.msk [vmem:[%s133_s5 + $0x2] sm:$0x3] %vm54_vm7, %v52_v9 }

</bundles_post_ra>
